<compile_context>
chip_gen: v6e
topology: v6e:2x2x1
jax: 0.10.0
libtpu: 0.0.40
codegen_flags: <defaults>
</compile_context>

<pallas_src>
import functools

import jax
import jax.numpy as jnp
import numpy as np
from jax import lax
from jax.experimental import pallas as pl
from jax.experimental.pallas import tpu as pltpu


# --------------------------------------------------------------------------
# Pallas kernels
# --------------------------------------------------------------------------

def _proj_kernel(x_ref, w_ref, b_ref, o_ref):
    # x_ref: (Ci, N)  w_ref: (Co, Ci)  b_ref: (Co, 1)  o_ref: (Co, N)
    x = x_ref[...].astype(jnp.float32)
    w = w_ref[...].astype(jnp.float32)
    b = b_ref[...].astype(jnp.float32)
    o_ref[...] = (jnp.dot(w, x, preferred_element_type=jnp.float32) + b
                  ).astype(o_ref.dtype)


def _project(x, w, b):
    """Single-block 1x1-conv matmul: (Co,Ci)x(Ci,N)+b -> (Co,N)."""
    Co, Ci = w.shape
    N = x.shape[1]
    return pl.pallas_call(
        _proj_kernel,
        out_shape=jax.ShapeDtypeStruct((Co, N), x.dtype),
        grid=(1,),
        in_specs=[
            pl.BlockSpec((Ci, N), lambda i: (0, 0)),
            pl.BlockSpec((Co, Ci), lambda i: (0, 0)),
            pl.BlockSpec((Co, 1), lambda i: (0, 0)),
        ],
        out_specs=pl.BlockSpec((Co, N), lambda i: (0, 0)),
        compiler_params=pltpu.CompilerParams(dimension_semantics=("parallel",)),
        cost_estimate=pl.CostEstimate(
            flops=int(2 * Co * Ci * N), transcendentals=0,
            bytes_accessed=int(4 * (Ci * N + Co * Ci + Co + Co * N))),
    )(x, w, b)


def _da_attn_kernel(tgt_ref, src_ref, wqvv_ref, bqvv_ref, wk_ref, bk_ref,
                    out_ref, epam_ref, ecam_ref, *, B, HW):
    # tgt_ref : (1, C, B*HW)   target features for level i (lane-dense)
    # src_ref : (L, C, B*HW)   all projected source features
    # wqvv_ref: (1, 3C, C)  bqvv_ref: (1, 3C, 1)   [pam_q ; pam_v ; cam_v] of level i
    # wk_ref  : (L, C, C)   bk_ref  : (L, C, 1)    pam_k of every source level j
    # out_ref : (1, C, B*HW)   0.5 * (PAM + CAM) output (lane-dense writeback)
    # epam_ref/ecam_ref: (1, 1, J)  raw-energy sums per source level j
    f32 = jnp.float32
    J = src_ref.shape[0]
    C = wk_ref.shape[1]

    tgt = tgt_ref[0].astype(f32)                                   # (C, B*HW)
    wqvv = wqvv_ref[0].astype(f32)                                 # (3C, C)
    bqvv = bqvv_ref[0].astype(f32)                                 # (3C, 1)
    # pam_q / pam_v / cam_v 1x1 convs for the whole batch in one MXU matmul.
    qvv = jnp.dot(wqvv, tgt, preferred_element_type=f32) + bqvv    # (3C, B*HW)

    # pam_k 1x1 convs on every source level (full batch, one matmul per j).
    srcs, keys_pam = [], []
    for j in range(J):
        s = src_ref[j].astype(f32)                                 # (C, B*HW)
        srcs.append(s)
        kj = (jnp.dot(wk_ref[j].astype(f32), s, preferred_element_type=f32)
              + bk_ref[j].astype(f32))
        keys_pam.append(kj)

    epam_acc = jnp.zeros((1, J), f32)
    ecam_acc = jnp.zeros((1, J), f32)
    out_parts = []
    for b in range(B):                                             # B is small, static
        lo, hi = b * HW, (b + 1) * HW
        q_b = qvv[0:C, lo:hi]                                      # (C, HW) PAM query
        vp_b = qvv[C:2 * C, lo:hi]                                 # (C, HW) PAM value
        vc_b = qvv[2 * C:3 * C, lo:hi]                             # (C, HW) CAM value
        tgt_b = tgt[:, lo:hi]                                      # (C, HW) CAM query

        # Batch the J loop into single lane-dense energy matmuls.
        k_pam_cat = jnp.concatenate([keys_pam[j][:, lo:hi] for j in range(J)],
                                    axis=1)                        # (C, J*HW)
        k_cam_cat = jnp.concatenate([srcs[j][:, lo:hi] for j in range(J)],
                                    axis=0)                        # (J*C, HW)

        # PAM energy: q^T @ k  -> (HW, J*HW); transpose folded into dot_general.
        e_pam = lax.dot_general(q_b, k_pam_cat, (((0,), (0,)), ((), ())),
                                preferred_element_type=f32)
        # CAM energy: q @ k^T  -> (C, J*C)
        e_cam = lax.dot_general(tgt_b, k_cam_cat, (((1,), (1,)), ((), ())),
                                preferred_element_type=f32)

        attn_pam = jnp.zeros((HW, HW), f32)
        attn_cam = jnp.zeros((C, C), f32)
        ep_parts, ec_parts = [], []
        for j in range(J):
            ej = e_pam[:, j * HW:(j + 1) * HW]                     # (HW, HW)
            ep_parts.append(jnp.sum(ej, keepdims=True))            # (1, 1)
            pj = jnp.exp(ej - jnp.max(ej, axis=-1, keepdims=True))
            attn_pam = attn_pam + pj / jnp.sum(pj, axis=-1, keepdims=True)

            cj = e_cam[:, j * C:(j + 1) * C]                       # (C, C)
            ec_parts.append(jnp.sum(cj, keepdims=True))            # (1, 1)
            gj = jnp.exp(cj - jnp.max(cj, axis=-1, keepdims=True))
            attn_cam = attn_cam + gj / jnp.sum(gj, axis=-1, keepdims=True)

        epam_acc = epam_acc + jnp.concatenate(ep_parts, axis=1)
        ecam_acc = ecam_acc + jnp.concatenate(ec_parts, axis=1)

        # PAM out = v @ attention^T (transpose folded); CAM out = attention @ v
        out_pam = lax.dot_general(vp_b, attn_pam, (((1,), (1,)), ((), ())),
                                  preferred_element_type=f32)      # (C, HW)
        out_cam = jnp.dot(attn_cam, vc_b, preferred_element_type=f32)  # (C, HW)
        out_parts.append(0.5 * (out_pam + out_cam))

    out_ref[0] = jnp.concatenate(out_parts, axis=1).astype(out_ref.dtype)
    epam_ref[0] = epam_acc
    ecam_ref[0] = ecam_acc


def _fused_attention(tgt_all, src_all, w_qvv, b_qvv, w_k, b_k, *, B, HW):
    """tgt_all/src_all: (L, C, B*HW). Returns ((L,C,B*HW), (L,1,J), (L,1,J))."""
    L, C, BHW = tgt_all.shape
    J = L
    C3 = 3 * C
    kernel = functools.partial(_da_attn_kernel, B=B, HW=HW)

    flops = L * (2 * C3 * C * BHW + J * 2 * C * C * BHW
                 + B * 2 * C * HW * (J * HW) + B * 2 * C * HW * (J * C)
                 + B * 2 * C * HW * HW + B * 2 * C * C * HW)
    transcendentals = L * B * J * (HW * HW + C * C)
    bytes_accessed = 4 * (3 * L * C * BHW + L * C3 * C + L * C3
                          + L * C * C + L * C + 2 * L * J)

    return pl.pallas_call(
        kernel,
        out_shape=(
            jax.ShapeDtypeStruct((L, C, BHW), tgt_all.dtype),
            jax.ShapeDtypeStruct((L, 1, J), jnp.float32),
            jax.ShapeDtypeStruct((L, 1, J), jnp.float32),
        ),
        grid=(L,),
        in_specs=[
            pl.BlockSpec((1, C, BHW), lambda i: (i, 0, 0)),
            pl.BlockSpec((L, C, BHW), lambda i: (0, 0, 0)),
            pl.BlockSpec((1, C3, C), lambda i: (i, 0, 0)),
            pl.BlockSpec((1, C3, 1), lambda i: (i, 0, 0)),
            pl.BlockSpec((L, C, C), lambda i: (0, 0, 0)),
            pl.BlockSpec((L, C, 1), lambda i: (0, 0, 0)),
        ],
        out_specs=(
            pl.BlockSpec((1, C, BHW), lambda i: (i, 0, 0)),
            pl.BlockSpec((1, 1, J), lambda i: (i, 0, 0)),
            pl.BlockSpec((1, 1, J), lambda i: (i, 0, 0)),
        ),
        compiler_params=pltpu.CompilerParams(dimension_semantics=("parallel",)),
        cost_estimate=pl.CostEstimate(flops=int(flops),
                                      transcendentals=int(transcendentals),
                                      bytes_accessed=int(bytes_accessed)),
    )(tgt_all, src_all, w_qvv, b_qvv, w_k, b_k)


# --------------------------------------------------------------------------
# Parameter init (deterministic, synthetic)
# --------------------------------------------------------------------------

def _conv_params(key, cin, cout):
    kw, kb = jax.random.split(key)
    bound = 1.0 / np.sqrt(cin)
    w = jax.random.uniform(kw, (cout, cin), jnp.float32, -bound, bound)
    b = jax.random.uniform(kb, (cout,), jnp.float32, -bound, bound)
    return w, b


def init_da_attention_params(key, origin_channels, C):
    L = len(origin_channels)
    params = {k: [] for k in
              ("proj_src", "proj_tgt", "pam_q", "pam_k", "pam_v", "cam_v")}
    keys = jax.random.split(key, 6 * L)
    for i, cin in enumerate(origin_channels):
        params["proj_src"].append(_conv_params(keys[6 * i + 0], cin, C))
        params["proj_tgt"].append(_conv_params(keys[6 * i + 1], cin, C))
        params["pam_q"].append(_conv_params(keys[6 * i + 2], C, C))
        params["pam_k"].append(_conv_params(keys[6 * i + 3], C, C))
        params["pam_v"].append(_conv_params(keys[6 * i + 4], C, C))
        params["cam_v"].append(_conv_params(keys[6 * i + 5], C, C))
    return params


# --------------------------------------------------------------------------
# DAAttention forward (Pallas)
# --------------------------------------------------------------------------

def _block_diag(mats):
    rows = sum(m.shape[0] for m in mats)
    cols = sum(m.shape[1] for m in mats)
    out = jnp.zeros((rows, cols), mats[0].dtype)
    r = c = 0
    for m in mats:
        out = out.at[r:r + m.shape[0], c:c + m.shape[1]].set(m)
        r += m.shape[0]
        c += m.shape[1]
    return out


def da_attention_forward(params, feat_sources, feat_targets, C, H, W):
    L = len(feat_targets)
    B = feat_targets[0].shape[0]
    HW = H * W
    BHW = B * HW

    # ---- fused projection: all 2*L Fit(1x1) convs as one block-diag matmul ----
    xs, ws, bs = [], [], []
    for i in range(L):
        cin = feat_sources[i].shape[1]
        x_src = feat_sources[i].reshape(B, cin, HW).transpose(1, 0, 2).reshape(cin, BHW)
        x_tgt = feat_targets[i].reshape(B, cin, HW).transpose(1, 0, 2).reshape(cin, BHW)
        xs += [x_src, x_tgt]
        ws += [params["proj_src"][i][0], params["proj_tgt"][i][0]]
        bs += [params["proj_src"][i][1], params["proj_tgt"][i][1]]
    x_cat = jnp.concatenate(xs, axis=0)                          # (sum_cin, B*HW)
    w_bd = _block_diag(ws)                                       # (2*L*C, sum_cin)
    b_cat = jnp.concatenate(bs, axis=0).reshape(-1, 1)           # (2*L*C, 1)
    proj = _project(x_cat, w_bd, b_cat).reshape(2 * L, C, BHW)
    src_all = proj[0::2]                                         # (L, C, B*HW)
    tgt_all = proj[1::2]                                         # (L, C, B*HW)

    # ---- stacked attention weights ----
    w_qvv = jnp.stack([jnp.concatenate([params["pam_q"][i][0],
                                        params["pam_v"][i][0],
                                        params["cam_v"][i][0]], axis=0)
                       for i in range(L)], axis=0)               # (L, 3C, C)
    b_qvv = jnp.stack([jnp.concatenate([params["pam_q"][i][1],
                                        params["pam_v"][i][1],
                                        params["cam_v"][i][1]], axis=0)
                       for i in range(L)], axis=0).reshape(L, 3 * C, 1)
    w_k = jnp.stack([params["pam_k"][j][0] for j in range(L)], axis=0)   # (L, C, C)
    b_k = jnp.stack([params["pam_k"][j][1] for j in range(L)], axis=0).reshape(L, C, 1)

    out_comb, esum_pam, esum_cam = _fused_attention(
        tgt_all, src_all, w_qvv, b_qvv, w_k, b_k, B=B, HW=HW)

    # ---- alpha (tiny (L, J) reductions done in the wrapper) ----
    alpha_pam = jax.nn.softmax(esum_pam[:, 0, :] / (B * HW * HW), axis=-1)
    alpha_cam = jax.nn.softmax(esum_cam[:, 0, :] / (B * C * C), axis=-1)
    ret_alpha = 0.5 * (alpha_cam + alpha_pam)

    # ---- back to (B, C*HW) layout ----
    def to_bflat(x):   # (C, B*HW) -> (B, C*HW)
        return x.reshape(C, B, HW).transpose(1, 0, 2).reshape(B, C * HW)

    ret_sources, ret_targets = [], []
    for i in range(L):
        ret_targets.append(to_bflat(out_comb[i]))
        ret_sources.append(to_bflat(src_all[i]))
        ret_targets.append(to_bflat(tgt_all[i]))
    return ret_sources, ret_alpha, ret_targets


# --------------------------------------------------------------------------
# Pure-JAX reference (mirrors the PyTorch forward) for correctness checking
# --------------------------------------------------------------------------

def _ref_conv(x, w, b):
    return jnp.einsum("oc,bcs->bos", w, x) + b[None, :, None]


def _ref_forward(params, feat_sources, feat_targets, C, H, W):
    L = len(feat_targets)
    B = feat_targets[0].shape[0]
    HW = H * W
    new_src = [_ref_conv(feat_sources[i].reshape(B, -1, HW), *params["proj_src"][i])
               for i in range(L)]
    new_tgt = [_ref_conv(feat_targets[i].reshape(B, -1, HW), *params["proj_tgt"][i])
               for i in range(L)]

    feat_pam, alpha_pam = [], []
    for i in range(L):
        q = jnp.swapaxes(_ref_conv(new_tgt[i], *params["pam_q"][i]), 1, 2)
        attns, means = [], []
        for j in range(L):
            k = _ref_conv(new_src[j], *params["pam_k"][j])
            energy = q @ k
            means.append(jnp.mean(energy))
            attns.append(jax.nn.softmax(energy, axis=-1))
        alpha_pam.append(jax.nn.softmax(jnp.stack(means)))
        attn = sum(attns)
        v = _ref_conv(new_tgt[i], *params["pam_v"][i])
        feat_pam.append(v @ jnp.swapaxes(attn, 1, 2))
    alpha_pam = jnp.stack(alpha_pam)

    feat_cam, alpha_cam = [], []
    for i in range(L):
        q = new_tgt[i]
        attns, means = [], []
        for j in range(L):
            k = jnp.swapaxes(new_src[j], 1, 2)
            energy = q @ k
            means.append(jnp.mean(energy))
            attns.append(jax.nn.softmax(energy, axis=-1))
        alpha_cam.append(jax.nn.softmax(jnp.stack(means)))
        attn = sum(attns)
        v = _ref_conv(new_tgt[i], *params["cam_v"][i])
        feat_cam.append(attn @ v)
    alpha_cam = jnp.stack(alpha_cam)

    ret_alpha = (alpha_cam + alpha_pam) * 0.5
    ret_sources, ret_targets = [], []
    for i in range(L):
        ret_targets.append(((feat_pam[i] + feat_cam[i]) * 0.5).reshape(B, C * HW))
        ret_sources.append(new_src[i].reshape(B, C * HW))
        ret_targets.append(new_tgt[i].reshape(B, C * HW))
    return ret_sources, ret_alpha, ret_targets


# --------------------------------------------------------------------------
# Main
# --------------------------------------------------------------------------

if __name__ == "__main__":
    B, C, H, W = 2, 32, 8, 8          # new_size = (-1, 32, 8, 8) -> B*HW = 128 lanes
    origin_channels = [16, 24]        # origin spatial == new spatial -> 1x1 Fit
    L = len(origin_channels)

    key = jax.random.PRNGKey(0)
    kparam, kdata = jax.random.split(key)
    params = init_da_attention_params(kparam, origin_channels, C)

    dkeys = jax.random.split(kdata, 2 * L)
    feat_sources = [jax.random.normal(dkeys[i], (B, origin_channels[i], H, W),
                                      jnp.float32) for i in range(L)]
    feat_targets = [jax.random.normal(dkeys[L + i], (B, origin_channels[i], H, W),
                                      jnp.float32) for i in range(L)]

    ret_sources, ret_alpha, ret_targets = da_attention_forward(
        params, feat_sources, feat_targets, C, H, W)
    jax.block_until_ready((ret_sources, ret_alpha, ret_targets))

    # correctness check against pure-JAX reference
    r_sources, r_alpha, r_targets = _ref_forward(
        params, feat_sources, feat_targets, C, H, W)
    for a, b in zip(ret_sources, r_sources):
        np.testing.assert_allclose(np.asarray(a), np.asarray(b), rtol=2e-4, atol=2e-4)
    for a, b in zip(ret_targets, r_targets):
        np.testing.assert_allclose(np.asarray(a), np.asarray(b), rtol=2e-4, atol=2e-4)
    np.testing.assert_allclose(np.asarray(ret_alpha), np.asarray(r_alpha),
                               rtol=2e-4, atol=2e-4)

    print("KERNEL_OK")
</pallas_src>

<mosaic_0001>
module attributes {stable_mosaic.version = 11 : i64} {
  func.func @_proj_kernel(%arg0: i32, %arg1: memref<80x128xf32, #tpu.memory_space<vmem>>, %arg2: memref<128x80xf32, #tpu.memory_space<vmem>>, %arg3: memref<128x1xf32, #tpu.memory_space<vmem>>, %arg4: memref<128x128xf32, #tpu.memory_space<vmem>>) attributes {dimension_semantics = [#tpu.dimension_semantics<parallel>], iteration_bounds = array<i64: 1>, scalar_prefetch = 0 : i64, scratch_operands = 0 : i64, tpu.core_type = #tpu.core_type<tc>, window_params = [{pipeline_mode = #tpu.pipeline_mode<synchronous>, transform_indices = @transform_0, window_bounds = array<i64: 80, 128>}, {pipeline_mode = #tpu.pipeline_mode<synchronous>, transform_indices = @transform_1, window_bounds = array<i64: 128, 80>}, {pipeline_mode = #tpu.pipeline_mode<synchronous>, transform_indices = @transform_2, window_bounds = array<i64: 128, 1>}, {pipeline_mode = #tpu.pipeline_mode<synchronous>, transform_indices = @transform_3, window_bounds = array<i64: 128, 128>}]} {
    %c0 = arith.constant 0 : index
    %c0_0 = arith.constant 0 : index
    %0 = vector.load %arg1[%c0, %c0_0] : memref<80x128xf32, #tpu.memory_space<vmem>>, vector<80x128xf32>
    %c0_1 = arith.constant 0 : index
    %c0_2 = arith.constant 0 : index
    %1 = vector.load %arg2[%c0_1, %c0_2] : memref<128x80xf32, #tpu.memory_space<vmem>>, vector<128x80xf32>
    %c0_3 = arith.constant 0 : index
    %c0_4 = arith.constant 0 : index
    %2 = vector.load %arg3[%c0_3, %c0_4] : memref<128x1xf32, #tpu.memory_space<vmem>>, vector<128x1xf32>
    %cst = arith.constant dense<0.000000e+00> : vector<128x128xf32>
    %3 = tpu.matmul %1, %0, %cst {dimension_numbers = #tpu.dot_dimension_numbers<[1], [0], [0], [1], [0, 0, 1, 1], [], []>} : vector<128x80xf32>, vector<80x128xf32>, vector<128x128xf32> -> vector<128x128xf32>
    %4 = vector.broadcast %2 : vector<128x1xf32> to vector<128x128xf32>
    %5 = arith.addf %3, %4 : vector<128x128xf32>
    %c0_5 = arith.constant 0 : index
    %c0_6 = arith.constant 0 : index
    %6 = vector.load %arg4[%c0_5, %c0_6] : memref<128x128xf32, #tpu.memory_space<vmem>>, vector<128x128xf32>
    tpu.vector_store %arg4[%c0_5, %c0_6], %5 {strides = array<i32>} : memref<128x128xf32, #tpu.memory_space<vmem>>, vector<128x128xf32>,
    return
  }
  func.func @transform_0(%arg0: i32) -> (i32, i32) {
    %c0_i32 = arith.constant 0 : i32
    %c0_i32_0 = arith.constant 0 : i32
    %c0_i32_1 = arith.constant 0 : i32
    return %c0_i32, %c0_i32_0 : i32, i32
  }
  func.func @transform_1(%arg0: i32) -> (i32, i32) {
    %c0_i32 = arith.constant 0 : i32
    %c0_i32_0 = arith.constant 0 : i32
    %c0_i32_1 = arith.constant 0 : i32
    return %c0_i32, %c0_i32_0 : i32, i32
  }
  func.func @transform_2(%arg0: i32) -> (i32, i32) {
    %c0_i32 = arith.constant 0 : i32
    %c0_i32_0 = arith.constant 0 : i32
    %c0_i32_1 = arith.constant 0 : i32
    return %c0_i32, %c0_i32_0 : i32, i32
  }
  func.func @transform_3(%arg0: i32) -> (i32, i32) {
    %c0_i32 = arith.constant 0 : i32
    %c0_i32_0 = arith.constant 0 : i32
    %c0_i32_1 = arith.constant 0 : i32
    return %c0_i32, %c0_i32_0 : i32, i32
  }
}

</mosaic_0001>

<bundles_post_ra>
// kernel: tpu_custom_call.1
= control target key start
LH: loop header
LB: loop body
LE: loop exit
PB: predicated region body
PF: predicated region fallthrough
CT: control target
= control target key end

     0   :  { %s666_s0 = inlined_call_operand.vmem [shape: f32[80,128], index: 0, kind: input, shape index: {}]   ;;  %s667_s1 = inlined_call_operand.vmem [shape: f32[128,80], index: 1, kind: input, shape index: {}]   ;;  %s668_s2 = inlined_call_operand.vmem [shape: f32[128,1], index: 2, kind: input, shape index: {}]   ;;  %s669_s3 = inlined_call_operand.hbm [shape: f32[128,128], index: 3, kind: output, shape index: {}]  }
   0x1   :  { %v24_v0 = vld [vmem:[%s666_s0 + $0x48] sm:$0xff]  ;;  %v23_v1 = vld [vmem:[%s666_s0 + $0x40] sm:$0xff]  ;;  %v22_v2 = vld [vmem:[%s666_s0 + $0x38] sm:$0xff] }
   0x2   :  { %405 = vmatprep.subr.mxu0 %v24_v0  ;;  %449 = vmatprep.subr.mxu1 %v24_v0  ;;  %v21_v3 = vld [vmem:[%s666_s0 + $0x30] sm:$0xff]  ;;  %v20_v4 = vld [vmem:[%s666_s0 + $0x28] sm:$0xff]  ;;  %v19_v5 = vld [vmem:[%s666_s0 + $0x20] sm:$0xff] }
   0x3   :  { %406 = vmatpush3.msra.mxu0 %v24_v0  ;;  %459 = vmatpush3.msra.mxu1 %v24_v0  ;;  %v18_v6 = vld [vmem:[%s666_s0 + $0x18] sm:$0xff]  ;;  %v17_v7 = vld [vmem:[%s666_s0 + $0x10] sm:$0xff]  ;;  %v16_v8 = vld [vmem:[%s666_s0 + $0x8] sm:$0xff] }
   0x4   :  { %407 = vmatprep.subr.mxu0 %v23_v1  ;;  %450 = vmatprep.subr.mxu1 %v23_v1 }
   0x5   :  { %408 = vmatpush3.msra.mxu0 %v23_v1  ;;  %460 = vmatpush3.msra.mxu1 %v23_v1 }
   0x6   :  { %409 = vmatprep.subr.mxu0 %v22_v2  ;;  %451 = vmatprep.subr.mxu1 %v22_v2 }
   0x7   :  { %410 = vmatpush3.msra.mxu0 %v22_v2  ;;  %461 = vmatpush3.msra.mxu1 %v22_v2 }
   0x8   :  { %411 = vmatprep.subr.mxu0 %v21_v3  ;;  %452 = vmatprep.subr.mxu1 %v21_v3 }
   0x9   :  { %412 = vmatpush3.msra.mxu0 %v21_v3  ;;  %462 = vmatpush3.msra.mxu1 %v21_v3 }
   0xa   :  { %413 = vmatprep.subr.mxu0 %v20_v4  ;;  %453 = vmatprep.subr.mxu1 %v20_v4 }
   0xb   :  { %414 = vmatpush3.msra.mxu0 %v20_v4  ;;  %463 = vmatpush3.msra.mxu1 %v20_v4 }
   0xc   :  { %415 = vmatprep.subr.mxu0 %v19_v5  ;;  %454 = vmatprep.subr.mxu1 %v19_v5 }
   0xd   :  { %416 = vmatpush3.msra.mxu0 %v19_v5  ;;  %464 = vmatpush3.msra.mxu1 %v19_v5 }
   0xe   :  { %417 = vmatprep.subr.mxu0 %v18_v6  ;;  %455 = vmatprep.subr.mxu1 %v18_v6 }
   0xf   :  { %418 = vmatpush3.msra.mxu0 %v18_v6  ;;  %465 = vmatpush3.msra.mxu1 %v18_v6 }
  0x10   :  { %8 = vsyncpa [#allocation3], 0  ;;  %419 = vmatprep.subr.mxu0 %v17_v7  ;;  %456 = vmatprep.subr.mxu1 %v17_v7  ;;  %v15_v9 = vld [vmem:[%s666_s0] sm:$0xff]  ;;  %vm137_vm0 = vcmask 654336   ;;  %v26_v12 = vld [vmem:[%s667_s1 + $0x8] sm:$0xff]  ;;  %v497_v22 = vmov 0  }
  0x11   :  { %420 = vmatpush3.msra.mxu0 %v17_v7  ;;  %466 = vmatpush3.msra.mxu1 %v17_v7  ;;  %v25_v10 = vld [vmem:[%s667_s1] sm:$0xff]  ;;  %v34_v13 = vld [vmem:[%s667_s1 + $0x48] sm:$0xff]  ;;  %v27_v14 = vld [vmem:[%s667_s1 + $0x10] sm:$0xff] }
  0x12   :  { %421 = vmatprep.subr.mxu0 %v16_v8  ;;  %457 = vmatprep.subr.mxu1 %v16_v8  ;;  %v33_v11 = vld [vmem:[%s667_s1 + $0x40] sm:$0xff]  ;;  %v35_v15 = vld [vmem:[%s667_s1 + $0x50] sm:$0xff]  ;;  %v28_v18 = vld [vmem:[%s667_s1 + $0x18] sm:$0xff] }
  0x13   :  { %422 = vmatpush3.msra.mxu0 %v16_v8  ;;  %467 = vmatpush3.msra.mxu1 %v16_v8  ;;  %v43_v16 = vld [vmem:[%s668_s2 + $0x10] sm:$0xff]  ;;  %v41_v17 = vld [vmem:[%s668_s2] sm:$0xff]  ;;  %v36_v19 = vld [vmem:[%s667_s1 + $0x58] sm:$0xff] }
  0x14   :  { %423 = vmatprep.subr.mxu0 %v15_v9  ;;  %458 = vmatprep.subr.mxu1 %v15_v9  ;;  %v29_v20 = vld [vmem:[%s667_s1 + $0x20] sm:$0xff]  ;;  %v44_v23 = vld [vmem:[%s668_s2 + $0x18] sm:$0xff]  ;;  %v42_v24 = vld [vmem:[%s668_s2 + $0x8] sm:$0xff] }
  0x15   :  { %424 = vmatpush3.msra.mxu0 %v15_v9  ;;  %468 = vmatpush3.msra.mxu1 %v15_v9  ;;  %v37_v21 = vld [vmem:[%s667_s1 + $0x60] sm:$0xff]  ;;  %v30_v25 = vld [vmem:[%s667_s1 + $0x28] sm:$0xff]  ;;  %v31_v27 = vld [vmem:[%s667_s1 + $0x30] sm:$0xff] }
  0x16   :  { %425 = vmatprep.mubr.msk.f32.mxu0 %vm137_vm0, %v25_v10  ;;  %437 = vmatprep.mubr.msk.f32.mxu1 %vm137_vm0, %v33_v11  ;;  %v38_v26 = vld [vmem:[%s667_s1 + $0x68] sm:$0xff]  ;;  %v39_v28 = vld [vmem:[%s667_s1 + $0x70] sm:$0xff]  ;;  %v45_v30 = vld [vmem:[%s668_s2 + $0x20] sm:$0xff] }
  0x17   :  { %426 = vmatmul.mubr.msk.f32.vlgmr.msra.gmra.mxu0 %vm137_vm0, %v26_v12  ;;  %438 = vmatmul.mubr.msk.f32.vlgmr.msra.gmra.mxu1 %vm137_vm0, %v34_v13  ;;  %v46_v29 = vld [vmem:[%s668_s2 + $0x28] sm:$0xff]  ;;  %v32_v31 = vld [vmem:[%s667_s1 + $0x38] sm:$0xff]  ;;  %v47_v34 = vld [vmem:[%s668_s2 + $0x30] sm:$0xff] }
  0x18   :  { %428 = vmatprep.mubr.msk.f32.mxu0 %vm137_vm0, %v27_v14  ;;  %440 = vmatprep.mubr.msk.f32.mxu1 %vm137_vm0, %v35_v15  ;;  %v40_v32 = vld [vmem:[%s667_s1 + $0x78] sm:$0xff]  ;;  %v50_v35 = vld [vmem:[%s668_s2 + $0x48] sm:$0xff]  ;;  %v49_v36 = vld [vmem:[%s668_s2 + $0x40] sm:$0xff] }
  0x19   :  { %474 = vset.pattern.permute.xlu1 %v497_v22  ;;  %473 = vset.pattern.permute.xlu0 %v497_v22  ;;  %v48_v33 = vld [vmem:[%s668_s2 + $0x38] sm:$0xff]  ;;  %v51_v38 = vld [vmem:[%s668_s2 + $0x50] sm:$0xff]  ;;  %v54_v39 = vld [vmem:[%s668_s2 + $0x68] sm:$0xff] }
  0x1a   :  { %69 = vperm.xlu1 %474, %v43_v16   ;;  %59 = vperm.xlu0 %473, %v41_v17   ;;  %v52_v37 = vld [vmem:[%s668_s2 + $0x58] sm:$0xff]  ;;  %v53_v40 = vld [vmem:[%s668_s2 + $0x60] sm:$0xff]  ;;  %v55_v42 = vld [vmem:[%s668_s2 + $0x70] sm:$0xff] }
  0x1b   :  { %429 = vmatmul.mubr.msk.f32.gmra.mxu0 %vm137_vm0, %v28_v18  ;;  %441 = vmatmul.mubr.msk.f32.gmra.mxu1 %vm137_vm0, %v36_v19  ;;  %v56_v41 = vld [vmem:[%s668_s2 + $0x78] sm:$0xff]  ;;  %s498_s2 = smov [#allocation2]  }
  0x1c   :  { %431 = vmatprep.mubr.msk.f32.mxu0 %vm137_vm0, %v29_v20  ;;  %443 = vmatprep.mubr.msk.f32.mxu1 %vm137_vm0, %v37_v21  ;;  %s352_s11 = sshll.u32 %s498_s2, 4  ;;  %s353_s11 = int_to_ptr.vmem [resolvable:$true] %s352_s11 }
  0x1d   :  { %s475_s12 = scalar_lea.vmem %s353_s11, 2048  ;;  %p480_p1 = scmp.lt.s32.totalorder %s353_s11, %s353_s11 }
  0x1e   :  { %74 = vperm.xlu1 %474, %v44_v23   ;;  %64 = vperm.xlu0 %473, %v42_v24   ;;  %p476_p0 = scmp.ne.s32.totalorder %s353_s11, %s475_s12  ;;  %p481_p2 = scmp.lt.s32.totalorder %s475_s12, %s475_s12 }
  0x1f   :  { %432 = vmatmul.mubr.msk.f32.gmra.mxu0 %vm137_vm0, %v30_v25  ;;  %444 = vmatmul.mubr.msk.f32.gmra.mxu1 %vm137_vm0, %v38_v26 }
  0x20   :  { %434 = vmatprep.mubr.msk.f32.mxu0 %vm137_vm0, %v31_v27  ;;  %446 = vmatprep.mubr.msk.f32.mxu1 %vm137_vm0, %v39_v28  ;;  %p482_p3 = por %p481_p2, %p480_p1 }
  0x22   :  { %84 = vperm.xlu1 %474, %v46_v29   ;;  %79 = vperm.xlu0 %473, %v45_v30   ;;  %p483_p4 = pnand %p482_p3, %p476_p0 }
  0x23   :  { %435 = vmatmul.mubr.msk.f32.gmra.mxu0 %vm137_vm0, %v32_v31  ;;  %447 = vmatmul.mubr.msk.f32.gmra.mxu1 %vm137_vm0, %v40_v32 }
  0x26   :  { %94 = vperm.xlu1 %474, %v48_v33   ;;  %89 = vperm.xlu0 %473, %v47_v34  }
  0x2a   :  { %104 = vperm.xlu1 %474, %v50_v35   ;;  %99 = vperm.xlu0 %473, %v49_v36  }
  0x2e   :  { %114 = vperm.xlu1 %474, %v52_v37   ;;  %109 = vperm.xlu0 %473, %v51_v38  }
  0x32   :  { %124 = vperm.xlu1 %474, %v54_v39   ;;  %119 = vperm.xlu0 %473, %v53_v40  }
  0x36   :  { %134 = vperm.xlu1 %474, %v56_v41   ;;  %129 = vperm.xlu0 %473, %v55_v42  }
  0x95   :  { %v70_v43 = vpop.permute.xlu1 %69  ;;  %v60_v44 = vpop.permute.xlu0 %59 }
  0x99   :  { %v75_v45 = vpop.permute.xlu1 %74  ;;  %v65_v46 = vpop.permute.xlu0 %64 }
  0x9d   :  { %v85_v47 = vpop.permute.xlu1 %84  ;;  %v80_v48 = vpop.permute.xlu0 %79 }
  0xa1   :  { %v95_v49 = vpop.permute.xlu1 %94  ;;  %v90_v50 = vpop.permute.xlu0 %89 }
  0xa5   :  { %v105_v51 = vpop.permute.xlu1 %104  ;;  %v100_v52 = vpop.permute.xlu0 %99 }
  0xa9   :  { %v115_v53 = vpop.permute.xlu1 %114  ;;  %v110_v56 = vpop.permute.xlu0 %109 }
  0xad   :  { %v125_v1 = vpop.permute.xlu1 %124  ;;  %v120_v6 = vpop.permute.xlu0 %119 }
  0xb1   :  { %v135_v15 = vpop.permute.xlu1 %134  ;;  %v130_v20 = vpop.permute.xlu0 %129 }
  0xd7   :  { %v427_v54 = vpop.f32.mrf.mxu0  ;;  %v439_v55 = vpop.f32.mrf.mxu1 }
  0xd8   :  { %v258_v57 = vadd.f32 %v427_v54, %v65_v46  ;;  %v298_v58 = vadd.f32 %v439_v55, %v105_v51 }
  0xd9   :  { %v252_v59 = vpop.f32.mrf.mxu0  ;;  %v292_v60 = vpop.f32.mrf.mxu1 }
  0xda   :  { %332 = vst [vmem:[#allocation2 + $0x8] sm:$0xff] %v258_v57  ;;  %340 = vst [vmem:[#allocation2 + $0x48] sm:$0xff] %v298_v58  ;;  %v253_v61 = vadd.f32 %v252_v59, %v60_v44  ;;  %v293_v62 = vadd.f32 %v292_v60, %v100_v52 }
  0xdb   :  { %v430_v63 = vpop.f32.mrf.mxu0  ;;  %v442_v0 = vpop.f32.mrf.mxu1 }
  0xdc   :  { %331 = vst [vmem:[#allocation2] sm:$0xff] %v253_v61  ;;  %339 = vst [vmem:[#allocation2 + $0x40] sm:$0xff] %v293_v62  ;;  %v268_v2 = vadd.f32 %v430_v63, %v75_v45  ;;  %v308_v3 = vadd.f32 %v442_v0, %v115_v53 }
  0xdd   :  { %v262_v4 = vpop.f32.mrf.mxu0  ;;  %v302_v5 = vpop.f32.mrf.mxu1 }
  0xde   :  { %334 = vst [vmem:[#allocation2 + $0x18] sm:$0xff] %v268_v2  ;;  %342 = vst [vmem:[#allocation2 + $0x58] sm:$0xff] %v308_v3  ;;  %v263_v7 = vadd.f32 %v262_v4, %v70_v43  ;;  %v303_v8 = vadd.f32 %v302_v5, %v110_v56 }
  0xdf   :  { %v433_v9 = vpop.f32.mrf.mxu0  ;;  %v445_v10 = vpop.f32.mrf.mxu1 }
  0xe0   :  { %333 = vst [vmem:[#allocation2 + $0x10] sm:$0xff] %v263_v7  ;;  %341 = vst [vmem:[#allocation2 + $0x50] sm:$0xff] %v303_v8  ;;  %v278_v11 = vadd.f32 %v433_v9, %v85_v47  ;;  %v318_v12 = vadd.f32 %v445_v10, %v125_v1 }
  0xe1   :  { %v272_v13 = vpop.f32.mrf.mxu0  ;;  %v312_v14 = vpop.f32.mrf.mxu1 }
  0xe2   :  { %336 = vst [vmem:[#allocation2 + $0x28] sm:$0xff] %v278_v11  ;;  %344 = vst [vmem:[#allocation2 + $0x68] sm:$0xff] %v318_v12  ;;  %v273_v16 = vadd.f32 %v272_v13, %v80_v48  ;;  %v313_v17 = vadd.f32 %v312_v14, %v120_v6 }
  0xe3   :  { %v436_v18 = vpop.f32.mrf.mxu0  ;;  %v448_v19 = vpop.f32.mrf.mxu1 }
  0xe4   :  { %335 = vst [vmem:[#allocation2 + $0x20] sm:$0xff] %v273_v16  ;;  %343 = vst [vmem:[#allocation2 + $0x60] sm:$0xff] %v313_v17  ;;  %v288_v21 = vadd.f32 %v436_v18, %v95_v49  ;;  %v328_v22 = vadd.f32 %v448_v19, %v135_v15 }
  0xe5   :  { %v282_v23 = vpop.f32.mrf.mxu0  ;;  %v322_v24 = vpop.f32.mrf.mxu1 }
  0xe6   :  { %338 = vst [vmem:[#allocation2 + $0x38] sm:$0xff] %v288_v21  ;;  %346 = vst [vmem:[#allocation2 + $0x78] sm:$0xff] %v328_v22  ;;  %v283_v25 = vadd.f32 %v282_v23, %v90_v50  ;;  %v323_v26 = vadd.f32 %v322_v24, %v130_v20 }
  0xe8   :  { %337 = vst [vmem:[#allocation2 + $0x30] sm:$0xff] %v283_v25  ;;  %345 = vst [vmem:[#allocation2 + $0x70] sm:$0xff] %v323_v26 }
  0xe9   :  { %486 = shalt.err (!%p483_p4)
}
  0xea   :  { %s499_s13 = smov 128   ;;  %s500_s14 = smov 8  }
  0xeb   :  { %358 = dma.vmem_to_hbm [thread:$0]  %s353_s11, 2048, %s669_s3, [#allocation3], %s499_s13, %s499_s13, %s500_s14  }
  0xec   :  { %495 = dma.done.wait [#allocation3], 2048  }
  0xed   :  { %496 = vsyncadd [#allocation3], 4294965248 }
  0xee   :  { %362 = vsyncpa [#allocation3], 1 }

</bundles_post_ra>
